<compile_context>
chip_gen: v6e
topology: v6e:2x2x1
jax: 0.10.0
libtpu: 0.0.40
codegen_flags: <defaults>
</compile_context>

<pallas_src>
import jax
import jax.numpy as jnp
from jax.experimental import pallas as pl
from jax.experimental.pallas import tpu as pltpu


def _pos_conv1x1_kernel(x_ref, w_ref, add_ref, o_ref):
    # x_ref:   (C, TN)  input block, channels on sublanes, spatial on lanes
    # w_ref:   (C, C)   weight restricted to the real input channels (resident)
    # add_ref: (C, TN)  fused positional-channel contribution + bias
    # o_ref:   (C, TN)
    o_ref[...] = (
        jnp.dot(w_ref[...], x_ref[...], preferred_element_type=jnp.float32)
        + add_ref[...]
    )


def positional_embedding_forward(x, weight, bias, pos_map, *, tn_max=2048):
    """x: (B, C, W, H) fp32 NCHW. weight: (C, C+1). bias: (C,). pos_map: (W, H).

    Returns (B, C, W, H) fp32, identical to
    Conv2d(C+1, C, 1)(concat([x, pos_map.expand(B,1,W,H)], dim=1)).
    """
    B, C, W, H = x.shape
    HW = W * H

    # --- Fuse positional channel + bias into a per-pixel additive term ------
    # Conv2d weight is (Cout=C, Cin=C+1); split off the positional column.
    w_x = weight[:, :C]                                   # (C, C)
    w_pos = weight[:, C]                                  # (C,)
    pos_flat = pos_map.reshape(HW)                        # (HW,)
    add_term = w_pos[:, None] * pos_flat[None, :] + bias[:, None]   # (C, HW)

    # --- Native layout: (B, C, W*H), spatial on the lane axis (free reshape) -
    x_flat = x.reshape(B, C, HW)

    # Lane-dense spatial tile: multiple of 128, as large as tn_max.
    tn = min(int(tn_max), pl.cdiv(HW, 128) * 128)
    hw_pad = pl.cdiv(HW, tn) * tn
    if hw_pad != HW:
        pad = hw_pad - HW
        x_flat = jnp.pad(x_flat, ((0, 0), (0, 0), (0, pad)))
        add_term = jnp.pad(add_term, ((0, 0), (0, pad)))

    grid = (B, hw_pad // tn)

    out_flat = pl.pallas_call(
        _pos_conv1x1_kernel,
        out_shape=jax.ShapeDtypeStruct((B, C, hw_pad), jnp.float32),
        grid_spec=pltpu.PrefetchScalarGridSpec(
            num_scalar_prefetch=0,
            grid=grid,
            in_specs=[
                # x block: batch dim squeezed, (C, tn) tile, spatial lane-dense.
                pl.BlockSpec((None, C, tn), lambda b, j: (b, 0, j)),
                # weight: tiny, resident across the whole grid.
                pl.BlockSpec((C, C), lambda b, j: (0, 0)),
                # fused pos+bias term: blocked along spatial only.
                pl.BlockSpec((C, tn), lambda b, j: (0, j)),
            ],
            out_specs=pl.BlockSpec((None, C, tn), lambda b, j: (b, 0, j)),
        ),
        compiler_params=pltpu.CompilerParams(
            dimension_semantics=("parallel", "parallel"),
        ),
    )(x_flat, w_x, add_term)

    if hw_pad != HW:
        out_flat = out_flat[:, :, :HW]
    return out_flat.reshape(B, C, W, H)


def make_params(key, width, height, channels):
    """Deterministic synthetic params matching nn.Conv2d(C+1, C, 1) shapes."""
    cin = channels + 1
    k_w, k_b = jax.random.split(key)
    # PyTorch Conv2d default init: U(-1/sqrt(fan_in), 1/sqrt(fan_in)), fan_in = cin.
    bound = 1.0 / jnp.sqrt(jnp.float32(cin))
    weight = jax.random.uniform(k_w, (channels, cin), jnp.float32, -bound, bound)
    bias = jax.random.uniform(k_b, (channels,), jnp.float32, -bound, bound)
    pos_map = jnp.linspace(-1.0, 1.0, width * height, dtype=jnp.float32).reshape(
        width, height
    )
    return weight, bias, pos_map


if __name__ == "__main__":
    B, C, W, H = 2, 4, 16, 16
    key = jax.random.PRNGKey(0)
    k_x, k_p = jax.random.split(key)

    x = jax.random.normal(k_x, (B, C, W, H), dtype=jnp.float32)
    weight, bias, pos_map = make_params(k_p, W, H, C)

    out = positional_embedding_forward(x, weight, bias, pos_map)
    out = jax.block_until_ready(out)

    # Pure-JAX reference of the original forward (concat + 1x1 conv).
    pos = jnp.broadcast_to(pos_map[None, None, :, :], (B, 1, W, H))
    x_cat = jnp.concatenate([x, pos], axis=1)
    ref = (
        jnp.einsum("bihw,oi->bohw", x_cat, weight)
        + bias[None, :, None, None]
    )
    assert out.shape == (B, C, W, H)
    assert jnp.allclose(out, ref, atol=1e-5, rtol=1e-5)

    print("KERNEL_OK")
</pallas_src>

<mosaic_0001>
module attributes {stable_mosaic.version = 11 : i64} {
  func.func @_pos_conv1x1_kernel(%arg0: i32, %arg1: i32, %arg2: memref<1x4x256xf32, #tpu.memory_space<vmem>>, %arg3: memref<4x4xf32, #tpu.memory_space<vmem>>, %arg4: memref<4x256xf32, #tpu.memory_space<vmem>>, %arg5: memref<1x4x256xf32, #tpu.memory_space<vmem>>) attributes {dimension_semantics = [#tpu.dimension_semantics<parallel>, #tpu.dimension_semantics<parallel>], iteration_bounds = array<i64: 2, 1>, scalar_prefetch = 0 : i64, scratch_operands = 0 : i64, tpu.core_type = #tpu.core_type<tc>, window_params = [{transform_indices = @transform_0, window_bounds = array<i64: 1, 4, 256>}, {pipeline_mode = #tpu.pipeline_mode<synchronous>, transform_indices = @transform_1, window_bounds = array<i64: 4, 4>}, {transform_indices = @transform_2, window_bounds = array<i64: 4, 256>}, {transform_indices = @transform_3, window_bounds = array<i64: 1, 4, 256>}]} {
    %c0 = arith.constant 0 : index
    %c0_0 = arith.constant 0 : index
    %0 = vector.load %arg3[%c0, %c0_0] : memref<4x4xf32, #tpu.memory_space<vmem>>, vector<4x4xf32>
    %c0_1 = arith.constant 0 : index
    %c0_2 = arith.constant 0 : index
    %c0_3 = arith.constant 0 : index
    %1 = vector.load %arg2[%c0_1, %c0_2, %c0_3] : memref<1x4x256xf32, #tpu.memory_space<vmem>>, vector<1x4x256xf32>
    %2 = vector.shape_cast %1 : vector<1x4x256xf32> to vector<4x256xf32>
    %cst = arith.constant dense<0.000000e+00> : vector<4x256xf32>
    %3 = tpu.matmul %0, %2, %cst {dimension_numbers = #tpu.dot_dimension_numbers<[1], [0], [0], [1], [0, 0, 1, 1], [], []>} : vector<4x4xf32>, vector<4x256xf32>, vector<4x256xf32> -> vector<4x256xf32>
    %c0_4 = arith.constant 0 : index
    %c0_5 = arith.constant 0 : index
    %4 = vector.load %arg4[%c0_4, %c0_5] : memref<4x256xf32, #tpu.memory_space<vmem>>, vector<4x256xf32>
    %5 = arith.addf %3, %4 : vector<4x256xf32>
    %c0_6 = arith.constant 0 : index
    %c0_7 = arith.constant 0 : index
    %c0_8 = arith.constant 0 : index
    %6 = vector.load %arg5[%c0_6, %c0_7, %c0_8] : memref<1x4x256xf32, #tpu.memory_space<vmem>>, vector<1x4x256xf32>
    %7 = vector.shape_cast %6 : vector<1x4x256xf32> to vector<4x256xf32>
    %8 = vector.shape_cast %5 : vector<4x256xf32> to vector<1x4x256xf32>
    tpu.vector_store %arg5[%c0_6, %c0_7, %c0_8], %8 {strides = array<i32>} : memref<1x4x256xf32, #tpu.memory_space<vmem>>, vector<1x4x256xf32>,
    return
  }
  func.func @transform_0(%arg0: i32, %arg1: i32) -> (i32, i32, i32) {
    %c0_i32 = arith.constant 0 : i32
    %c0_i32_0 = arith.constant 0 : i32
    return %arg0, %c0_i32, %arg1 : i32, i32, i32
  }
  func.func @transform_1(%arg0: i32, %arg1: i32) -> (i32, i32) {
    %c0_i32 = arith.constant 0 : i32
    %c0_i32_0 = arith.constant 0 : i32
    %c0_i32_1 = arith.constant 0 : i32
    return %c0_i32, %c0_i32_0 : i32, i32
  }
  func.func @transform_2(%arg0: i32, %arg1: i32) -> (i32, i32) {
    %c0_i32 = arith.constant 0 : i32
    %c0_i32_0 = arith.constant 0 : i32
    return %c0_i32, %arg1 : i32, i32
  }
  func.func @transform_3(%arg0: i32, %arg1: i32) -> (i32, i32, i32) {
    %c0_i32 = arith.constant 0 : i32
    %c0_i32_0 = arith.constant 0 : i32
    return %arg0, %c0_i32, %arg1 : i32, i32, i32
  }
}

</mosaic_0001>

<bundles_post_ra>
// kernel: tpu_custom_call.1
= control target key start
LH: loop header
LB: loop body
LE: loop exit
PB: predicated region body
PF: predicated region fallthrough
CT: control target
= control target key end

     0   :  { %8 = vsyncpa [#allocation3], 0  ;;  %s931_s0 = inlined_call_operand.hbm [shape: f32[2,4,256], index: 0, kind: input, shape index: {}]   ;;  %s932_s1 = inlined_call_operand.hbm [shape: f32[4,4], index: 1, kind: input, shape index: {}]   ;;  %s933_s2 = inlined_call_operand.hbm [shape: f32[4,256], index: 2, kind: input, shape index: {}]   ;;  %s934_s3 = inlined_call_operand.hbm [shape: f32[2,4,256], index: 3, kind: output, shape index: {}]  }
   0x1   :  { %10 = vsyncpa [#allocation3 + $0x1], 0 }
   0x2   :  { %11 = vsyncpa [#allocation6], 0 }
   0x3   :  { %12 = vsyncpa [#allocation4], 0 }
   0x4   :  { %14 = vsyncpa [#allocation4 + $0x1], 0  ;;  %s757_s12 = smov 0   ;;  %s759_s13 = smov 0  }
   0x5   :  { %s761_s14 = smov 0   ;;  %s763_s15 = smov 0  }
   0x6   :  { %s765_s16 = smov 0   ;;  %s767_s17 = smov 0  }
   0x7 LB: > { %s456_s18 = sadd.s32 4294967295, %s730_s17   ;;  %s457_s19 = sadd.s32 4294967294, %s730_s17   ;;  %s730_s17 = sphi %s767_s17, %s20_s17   ;;  %s726_s16 = sphi %s765_s16, %s957_s16   ;;  %s722_s15 = sphi %s763_s15, %s956_s15   ;;  %s718_s14 = sphi %s761_s14, %s955_s14   ;;  %s714_s13 = sphi %s759_s13, %s954_s13   ;;  %s710_s12 = sphi %s757_s12, %s953_s12  }
   0x8   : > { %p54_p0 = scmp.ne.s32.totalorder %s714_s13, %s710_s12  ;;  %p791_p1 = scmp.eq.s32.totalorder %s456_s18, 0 }
   0x9   : > { %p795_p2 = scmp.eq.s32.totalorder %s456_s18, 1  ;;  %p133_p3 = scmp.eq.s32.totalorder %s457_s19, 1 }
   0xa   : > { %s939_s20 = scalar_select %p791_p1, 1, 0 }
   0xb   : > { %s940_s21 = scalar_select %p795_p2, 1, 0 }
   0xc   : > { %p801_p4 = por %p791_p1, %p54_p0  ;;  %p458_p5 = scmp.ge.s32.totalorder %s730_s17, 1 }
   0xd   : > { %p806_p6 = por %p133_p3, %p54_p0  ;;  %p140_p7 = scmp.lt.s32.totalorder %s730_s17, 3 }
   0xe   : > { %s941_s22 = scalar_select %p801_p4, 1, 0 }
   0xf   : > { %s942_s23 = scalar_select %p806_p6, 1, 0 }
  0x10   : > { %p811_p8 = pnand %p458_p5, %p140_p7  ;;  %s732_s25 = smov [#allocation5]  }
  0x11   : > { %s153_s26 = sshll.u32 %s732_s25, 4  ;;  %s733_s27 = smov [#allocation7]   ;;  %s154_s26 = int_to_ptr.vmem [resolvable:$true] %s153_s26 }
  0x12   : > { %s943_s24 = scalar_select %p811_p8, 1, 0 }
  0x13   : > { %p492_p10 = pneg %p811_p8  ;;  %s167_s28 = sshll.u32 %s733_s27, 4  ;;  %s168_s28 = int_to_ptr.vmem [resolvable:$true] %s167_s28 }
  0x14   : > { %s577_s30 = scalar_lea.vmem %s154_s26, 64  ;;  %p585_p5 = scmp.lt.s32.totalorder %s154_s26, %s154_s26 }
  0x15   : > { %p820_p11 = pnand %p492_p10, %p791_p1  ;;  %p578_p13 = scmp.ne.s32.totalorder %s154_s26, %s577_s30 }
  0x16   : > { %p586_p7 = scmp.lt.s32.totalorder %s577_s30, %s577_s30 }
  0x17   : > { %p568_p12 = pneg %p820_p11 }
  0x18   : > { %p587_p9 = por %p586_p7, %p585_p5 }
  0x19   : > { %p580_p0 = pnand %p578_p13, %p568_p12 }
  0x1b   : > { %p581_p3 = pneg %p580_p0 }
  0x1d   : > { %p588_p6 = pnand %p587_p9, %p581_p3 }
  0x1f   : > { %591 = shalt.err (!%p588_p6)
}
  0x20   : > { %495 = dma.hbm_to_vmem [thread:$0]  (!%p820_p11), %s932_s1, 64, %s154_s26, [#allocation6]  }
  0x21   : > { %s603_s6 = scalar_lea.vmem %s168_s28, 128  ;;  %p611_p13 = scmp.lt.s32.totalorder %s168_s28, %s168_s28 }
  0x22   : > { %p604_p10 = scmp.ne.s32.totalorder %s168_s28, %s603_s6  ;;  %p612_p0 = scmp.lt.s32.totalorder %s603_s6, %s603_s6 }
  0x24   : > { %p606_p1 = pnand %p604_p10, %p568_p12  ;;  %p613_p8 = por %p612_p0, %p611_p13 }
  0x26   : > { %p607_p4 = pneg %p606_p1 }
  0x28   : > { %p614_p2 = pnand %p613_p8, %p607_p4 }
  0x2a   : > { %617 = shalt.err (!%p614_p2)
}
  0x2b   : > { %498 = dma.hbm_to_vmem [thread:$0]  (!%p820_p11), %s933_s2, 128, %s168_s28, [#allocation6]  }
  0x2c   : > { %s32_s9 = sadd.s32 1, %s726_s16  ;;  %s41_s10 = sadd.s32 1, %s718_s14 }
  0x2d   : > { %p34_p1 = scmp.ge.s32.totalorder %s32_s9, 2  ;;  %p48_p2 = scmp.ne.s32.totalorder %s718_s14, %s714_s13 }
  0x2e   : > { %p49_p4 = scmp.eq.s32.totalorder %s730_s17, 0  ;;  %p509_p6 = scmp.lt.s32.totalorder %s730_s17, 2 }
  0x2f   : > { %s959_s9 = smov (%p34_p1, %s32_s9), 0  ;;  %p945_p9 = scmp.ne.s32.totalorder %s940_s21, 0 }
  0x30   : > { %p50_p8 = por %p49_p4, %p48_p2  ;;  %s36_s18 = ssub.s32 %s726_s16, %s959_s9 }
  0x31   : > { %p852_p12 = por %p945_p9, %p48_p2  ;;  %s178_s19 = sand.u32 1, %s718_s14  }
  0x32   : > { %p39_p3 = scmp.eq.s32.totalorder %s36_s18, 0  ;;  %s462_s25 = sshll.u32 %s178_s19, 3 }
  0x33   : > { %s478_s26 = sshll.u32 %s726_s16, 7  ;;  %s182_s4 = scalar_lea.vmem [#allocation2], %s462_s25 }
  0x34   : > { %s861_s27 = scalar_select %p39_p3, %s718_s14, %s41_s10  }
  0x35   : > { %s190_s30 = scalar_lea.hbm %s931_s0, %s478_s26  ;;  %s192_s5 = sshll.u32 %s182_s4, 4  ;;  %s193_s5 = int_to_ptr.vmem [resolvable:$true] %s192_s5 }
  0x36   : > { %p868_p11 = pnand %p509_p6, %p50_p8  ;;  %s179_s6 = scalar_lea.sflag [#allocation3], %s178_s19 }
  0x37   : > { %s631_s7 = scalar_lea.vmem %s193_s5, 128  ;;  %s734_s8 = smov [#allocation2]  }
  0x38   : > { %p620_p5 = pneg %p868_p11  ;;  %p632_p7 = scmp.ne.s32.totalorder %s193_s5, %s631_s7 }
  0x39   : > { %s636_s10 = sshll.u32 %s734_s8, 4  ;;  %s637_s10 = int_to_ptr.vmem [resolvable:$false] %s636_s10 }
  0x3a   : > { %p634_p10 = pnand %p632_p7, %p620_p5  ;;  %s638_s18 = scalar_lea.vmem %s637_s10, 256 }
  0x3b   : > { %p639_p0 = scmp.lt.s32.totalorder %s193_s5, %s637_s10  ;;  %p640_p1 = scmp.lt.s32.totalorder %s638_s18, %s631_s7 }
  0x3c   : > { %p635_p13 = pneg %p634_p10 }
  0x3d   : > { %p641_p2 = por %p640_p1, %p639_p0 }
  0x3f   : > { %p642_p4 = pnand %p641_p2, %p635_p13 }
  0x41   : > { %645 = shalt.err (!%p642_p4)
}
  0x42   : > { %502 = dma.hbm_to_vmem [thread:$0]  (!%p868_p11), %s190_s30, 128, %s193_s5, %s179_s6  }
  0x43   : > { %p948_p6 = scmp.ne.s32.totalorder %s943_s24, 0 }
  0x44   : > { %s879_s19 = sand.u32 (!%p948_p6), 1, %s714_s13   ;;  %p949_p8 = scmp.ne.s32.totalorder (!%p948_p6), %s941_s22, 0 }
  0x45   : > { %201 = sbr.rel (%p948_p6) target bundleno = 295 (0x127), region = 32  ;;  %s466_s25 = sshll.u32 (!%p948_p6), %s879_s19, 3 }
  0x46   : > { %s204_s26 = scalar_lea.sflag (!%p948_p6), [#allocation3], %s879_s19  ;;  %s207_s28 = scalar_lea.vmem (!%p948_p6), [#allocation2], %s466_s25 }
  0x4a   : > { %697 = dma.done.wait (%p949_p8), %s204_s26, 128  }
  0x4b   : > { %699 = vsyncadd (%p949_p8), %s204_s26, 4294967168  ;;  %p950_p9 = scmp.ne.s32.totalorder %s939_s20, 0 }
  0x4d   : > { %701 = dma.done.wait (%p950_p9), [#allocation6], 192  }
  0x4e   : > { %703 = vsyncadd (%p950_p9), [#allocation6], 4294967104  ;;  %v735_v0 = vmov 0.0   ;;  %v242_v1 = vld [vmem:[%s207_s28] sm:$0xff]  ;;  %vm253_vm0 = vcmask 1043456   ;;  %vm249_vm1 = vcmask 31744  }
  0x4f   : > { %322 = vmatprep.mubr.f32.mxu0 %v735_v0  ;;  %v245_v2 = vcombine.high %v242_v1, %v242_v1  ;;  %v241_v3 = vld [vmem:[#allocation5] sm:$0xf]  ;;  %v243_v4 = vld [vmem:[#allocation7] sm:$0xff]  ;;  %s479_s22 = sshll.u32 %s722_s15, 7  ;;  %s237_s20 = scalar_lea.vmem [#allocation8], %s466_s25 }
  0x50   : > { %v247_v5 = vcombine.high %v243_v4, %v243_v4  ;;  %s351_s24 = sshll.u32 %s237_s20, 4  ;;  %s349_s4 = scalar_lea.hbm %s934_s3, %s479_s22  ;;  %s352_s24 = int_to_ptr.vmem [resolvable:$true] %s351_s24 }
  0x51   : > { %470 = vmatprep.subr.msk.mxu0 %vm253_vm0, %v245_v2  ;;  %s335_s5 = scalar_lea.sflag [#allocation4], %s879_s19  ;;  %s646_s21 = scalar_lea.vmem %s352_s24, 128 }
  0x52   : > { %471 = vmatpush1.msk.msra.mxu0 %vm253_vm0, %v242_v1  ;;  %p647_p3 = scmp.ne.s32.totalorder %s352_s24, %s646_s21  ;;  %s736_s6 = smov [#allocation8]  }
  0x53   : > { %472 = vmatmul.mubr.msk.f32.vlgmr.msra.gmra.mxu0 %vm249_vm1, %v241_v3  ;;  %s650_s7 = sshll.u32 %s736_s6, 4  ;;  %s651_s7 = int_to_ptr.vmem [resolvable:$false] %s650_s7 }
  0x54   : > { %p648_p11 = pnand %p647_p3, %p852_p12  ;;  %s652_s15 = scalar_lea.vmem %s651_s7, 256 }
  0x55   : > { %p653_p7 = scmp.lt.s32.totalorder %s352_s24, %s651_s7  ;;  %p654_p10 = scmp.lt.s32.totalorder %s652_s15, %s646_s21 }
  0x56   : > { %p649_p5 = pneg %p648_p11 }
  0x57   : > { %p655_p13 = por %p654_p10, %p653_p7 }
  0x59   : > { %p656_p0 = pnand %p655_p13, %p649_p5 }
 0x113   : > { %v324_v6 = vpop.f32.mrf.mxu0 }
 0x114   : > { %v325_v8 = vadd.f32 %v324_v6, %v243_v4 }
 0x115   : > { %v326_v7 = vpop.f32.mrf.mxu0 }
 0x116   : > { %v327_v9 = vadd.f32 %v326_v7, %v247_v5 }
 0x118   : > { %v331_v10 = vcombine.low %v325_v8, %v327_v9 }
 0x11a   : > { %333 = vst [vmem:[%s237_s20] sm:$0xff] %v331_v10 }
 0x11b   : > { %659 = shalt.err (!%p656_p0)
}
 0x11c   : > { %s660_s8 = scalar_lea.hbm %s349_s4, 128  ;;  %s664_s19 = scalar_lea.hbm %s934_s3, 256 }
 0x11d   : > { %p661_p1 = scmp.ne.s32.totalorder %s349_s4, %s660_s8  ;;  %p665_p6 = scmp.lt.s32.totalorder %s349_s4, %s934_s3 }
 0x11e   : > { %p666_p8 = scmp.lt.s32.totalorder %s664_s19, %s660_s8 }
 0x11f   : > { %p662_p2 = pnand %p661_p1, %p852_p12 }
 0x120   : > { %p667_p9 = por %p666_p8, %p665_p6 }
 0x121   : > { %p663_p4 = pneg %p662_p2 }
 0x123   : > { %p668_p3 = pnand %p667_p9, %p663_p4 }
 0x125   : > { %671 = shalt.err (!%p668_p3)
}
 0x126   : > { %490 = dma.vmem_to_hbm [thread:$0]  (%p852_p12), %s352_s24, 128, %s349_s4, %s335_s5  }
 0x127 PF: > { %s363_s28 = sand.u32 1, %s710_s12   ;;  %p951_p11 = scmp.ne.s32.totalorder %s942_s23, 0 }
 0x128   : > { %p952_p5 = scmp.ge.s32.totalorder %s730_s17, 2  ;;  %s364_s22 = scalar_lea.sflag [#allocation4], %s363_s28 }
 0x12a   : > { %p504_p7 = pnand %p952_p5, %p951_p11 }
 0x12c   : > { %p505_p10 = pneg %p504_p7 }
 0x12e   : > { %705 = dma.done.wait (%p505_p10), %s364_s22, 128  }
 0x12f   : > { %707 = vsyncadd (%p505_p10), %s364_s22, 4294967168  ;;  %s20_s17 = sadd.s32 1, %s730_s17   ;;  %s953_s12 = smov %s714_s13 }
 0x130   : > { %p17_p13 = scmp.ge.s32.totalorder %s20_s17, 4   ;;  %s954_s13 = smov %s718_s14 }
 0x131   : > { %s955_s14 = smov %s861_s27  ;;  %s956_s15 = smov %s726_s16 }
 0x132   : > { %s957_s16 = smov %s959_s9  ;;  %19 = sbr.rel (!%p17_p13) target bundleno = 7 (0x7), region = 86 }
 0x137   :  { %369 = vsyncpa [#allocation3], 1 }
 0x138   :  { %371 = vsyncpa [#allocation3 + $0x1], 1 }
 0x139   :  { %372 = vsyncpa [#allocation6], 1 }
 0x13a   :  { %373 = vsyncpa [#allocation4], 1 }
 0x13b   :  { %375 = vsyncpa [#allocation4 + $0x1], 1 }

</bundles_post_ra>
